<compile_context>
chip_gen: v5e
topology: v5e:2x2
jax: 0.10.0
libtpu: 0.0.40
codegen_flags: <defaults>
</compile_context>

<pallas_src>
import jax
import jax.numpy as jnp
from jax import lax
from jax.experimental import pallas as pl
from jax.experimental.pallas import tpu as pltpu


def critic_kernel(x_ref, w1_ref, w2_ref, aux_ref, b3_ref, out_ref):
    """One batch tile of the critic MLP; batch lives on the LANE axis.

    x_ref  : (tb, state_dim)      f32 input tile (row-major, as stored in HBM)
    w1_ref : (hidden, state_dim)  compute dtype (bf16 by default)
    w2_ref : (hidden, hidden)     compute dtype
    aux_ref: (hidden, 3)          f32, columns = [b1 | b2 | value-head weights]
    b3_ref : (1, 1)               f32 scalar in SMEM (value-head bias)
    out_ref: (1, tb)              f32 lane-dense value slab
    """
    x = x_ref[...].astype(w1_ref.dtype)            # cast once, in VMEM
    aux = aux_ref[...]
    b1 = aux[:, 0:1]                               # (hidden, 1)
    b2 = aux[:, 1:2]
    w3 = aux[:, 2:3]

    # h1 = W1 @ x^T (contract last axes) -> (hidden, tb); MXU, f32 accumulate.
    h1 = lax.dot_general(w1_ref[...], x, (((1,), (1,)), ((), ())),
                         preferred_element_type=jnp.float32)
    h1 = jnp.maximum(h1 + b1, 0.0)

    # h2 = W2 @ h1 -> (hidden, tb); fuse the value-head scale into the ReLU so
    # only one (hidden, tb) f32 temp is live at a time.
    h2 = jnp.dot(w2_ref[...], h1.astype(w2_ref.dtype),
                 preferred_element_type=jnp.float32)
    h2 = jnp.maximum(h2 + b2, 0.0) * w3

    # Value head (out_features == 1): XLU sublane reduction instead of an N=1
    # MXU matmul; result is already (1, tb) lane-dense.
    v = jnp.sum(h2, axis=0, keepdims=True)         # (1, tb)
    out_ref[...] = (v + b3_ref[0, 0]).astype(out_ref.dtype)


def _round_up(x, m):
    return ((x + m - 1) // m) * m


def _build_call(state_dim, hidden, tb, n_tiles, Bp, vmem_limit_bytes,
                weight_buffers):
    """Construct the pallas_call.  weight_buffers=None -> default pipelining."""
    const = lambda i: (0, 0)
    if weight_buffers is None:
        def wspec(shape):
            return pl.BlockSpec(shape, const)
    else:
        def wspec(shape):
            return pl.BlockSpec(shape, const,
                                pipeline_mode=pl.Buffered(weight_buffers))

    return pl.pallas_call(
        critic_kernel,
        out_shape=jax.ShapeDtypeStruct((1, Bp), jnp.float32),
        grid_spec=pl.GridSpec(
            grid=(n_tiles,),
            in_specs=[
                pl.BlockSpec((tb, state_dim), lambda i: (i, 0)),      # x tile
                wspec((hidden, state_dim)),                           # W1
                wspec((hidden, hidden)),                              # W2
                wspec((hidden, 3)),                                   # [b1|b2|w3]
                pl.BlockSpec(memory_space=pltpu.MemorySpace.SMEM),    # b3 scalar
            ],
            out_specs=pl.BlockSpec((1, tb), lambda i: (0, i)),        # lane-dense
        ),
        compiler_params=pltpu.CompilerParams(
            dimension_semantics=("parallel",),
            vmem_limit_bytes=vmem_limit_bytes,
        ),
    )


def critic_forward(state, params, *, tb=None, compute_dtype=jnp.bfloat16):
    """state: [B, state_dim] f32; params in PyTorch layout (W [out,in], b [out]).

    Returns value: [B, 1] f32.
    """
    W1, b1, W2, b2, W3, b3 = params
    B, state_dim = state.shape
    hidden = W1.shape[0]

    # ---- batch-tile selection (lane-dense, 128-aligned) --------------------
    # vreg-pressure cap: keep one (hidden, tb) f32 intermediate within the
    # 256 KiB vreg file (tb <= 65536 / hidden) so big tiles don't spill.
    tb_cap = min(1024, max(128, ((65536 // max(hidden, 1)) // 128) * 128))
    if tb is None:
        if B < 256:
            tb = min(_round_up(B, 128), tb_cap)        # 1 (or few) tile(s)
        else:
            # >= 2 grid steps so the 'parallel' batch axis splits across the
            # two TensorCores on v7x; pick the largest tile <= tb_cap while
            # minimising padding.
            n_tiles = max(2, -(-_round_up(B, 128) // tb_cap))
            tb = _round_up(-(-B // n_tiles), 128)
    tb = max(128, _round_up(tb, 128))
    n_tiles = -(-B // tb)
    Bp = n_tiles * tb

    # ---- operand prep (no transpose of x; it stays (B, state_dim)) ---------
    x = state.astype(jnp.float32)
    if Bp != B:
        x = jnp.pad(x, ((0, Bp - B), (0, 0)))          # zero rows, sliced off

    w1 = W1.astype(compute_dtype)                      # (hidden, state_dim)
    w2 = W2.astype(compute_dtype)                      # (hidden, hidden)
    aux = jnp.stack(
        [b1.astype(jnp.float32),
         b2.astype(jnp.float32),
         W3.reshape(hidden).astype(jnp.float32)], axis=1)   # (hidden, 3)
    b3c = jnp.asarray(b3, jnp.float32).reshape(1, 1)

    # ---- explicit VMEM budget (v5e scoped default is only 16 MiB) ----------
    weight_bytes = int(w1.nbytes) + int(w2.nbytes) + int(aux.nbytes)
    tile_bytes = 2 * (tb * state_dim * 4) + 2 * (tb * 4)    # double-buffered x/out
    scratch_bytes = 4 * hidden * tb * 4                     # h1/h2 headroom
    vmem_limit = int(min(max(2 * weight_bytes + tile_bytes + scratch_bytes,
                             32 * 1024 * 1024),
                         64 * 1024 * 1024))

    args = (x, w1, w2, aux, b3c)
    try:
        out = _build_call(state_dim, hidden, tb, n_tiles, Bp, vmem_limit,
                          weight_buffers=1)(*args)
    except Exception:
        # Fallback for JAX versions without per-BlockSpec pipeline_mode.
        out = _build_call(state_dim, hidden, tb, n_tiles, Bp, vmem_limit,
                          weight_buffers=None)(*args)

    return out.reshape(Bp, 1)[:B]


def init_params(key, state_dim, hidden_dim):
    """nn.Linear-style init in PyTorch layout: W [out, in], b [out]."""
    ks = jax.random.split(key, 6)

    def uniform(k, shape, fan_in):
        bound = 1.0 / jnp.sqrt(fan_in)
        return jax.random.uniform(k, shape, jnp.float32, -bound, bound)

    W1 = uniform(ks[0], (hidden_dim, state_dim), state_dim)
    b1 = uniform(ks[1], (hidden_dim,), state_dim)
    W2 = uniform(ks[2], (hidden_dim, hidden_dim), hidden_dim)
    b2 = uniform(ks[3], (hidden_dim,), hidden_dim)
    W3 = uniform(ks[4], (1, hidden_dim), hidden_dim)
    b3 = uniform(ks[5], (1,), hidden_dim)
    return (W1, b1, W2, b2, W3, b3)


def critic_ref(state, params):
    """Pure-JAX reference (PyTorch semantics: x @ W.T + b)."""
    W1, b1, W2, b2, W3, b3 = params
    h1 = jnp.maximum(state @ W1.T + b1, 0.0)
    h2 = jnp.maximum(h1 @ W2.T + b2, 0.0)
    return h2 @ W3.T + b3


if __name__ == "__main__":
    key = jax.random.PRNGKey(0)
    k_in, k_params = jax.random.split(key)

    B, state_dim, hidden_dim = 8, 16, 32
    state = jax.random.normal(k_in, (B, state_dim), jnp.float32)
    params = init_params(k_params, state_dim, hidden_dim)

    expected = critic_ref(state, params)

    # f32 compute path: tight check against the reference.
    value_f32 = jax.block_until_ready(
        critic_forward(state, params, compute_dtype=jnp.float32))
    assert value_f32.shape == (B, 1)
    assert jnp.allclose(value_f32, expected, atol=1e-3, rtol=1e-3)

    # Default bf16 MXU path: looser tolerance (bf16 operands, f32 accumulation).
    value_bf16 = jax.block_until_ready(critic_forward(state, params))
    assert value_bf16.shape == (B, 1)
    assert jnp.allclose(value_bf16, expected, atol=5e-2, rtol=5e-2)

    # Multi-tile (grid > 1) path with a ragged batch to exercise padding/grid.
    B2 = 300
    state2 = jax.random.normal(jax.random.PRNGKey(1), (B2, state_dim),
                               jnp.float32)
    expected2 = critic_ref(state2, params)
    value2 = jax.block_until_ready(
        critic_forward(state2, params, compute_dtype=jnp.float32, tb=128))
    assert value2.shape == (B2, 1)
    assert jnp.allclose(value2, expected2, atol=1e-3, rtol=1e-3)

    print("KERNEL_OK")
</pallas_src>

<mosaic_0001>
module attributes {stable_mosaic.version = 11 : i64} {
  func.func @critic_kernel(%arg0: i32, %arg1: memref<128x16xf32, #tpu.memory_space<vmem>>, %arg2: memref<32x16xf32, #tpu.memory_space<vmem>>, %arg3: memref<32x32xf32, #tpu.memory_space<vmem>>, %arg4: memref<32x3xf32, #tpu.memory_space<vmem>>, %arg5: memref<1x1xf32, #tpu.memory_space<smem>>, %arg6: memref<1x128xf32, #tpu.memory_space<vmem>>) attributes {dimension_semantics = [#tpu.dimension_semantics<parallel>], iteration_bounds = array<i64: 1>, scalar_prefetch = 0 : i64, scratch_operands = 0 : i64, tpu.core_type = #tpu.core_type<tc>, window_params = [{transform_indices = @transform_0, window_bounds = array<i64: 128, 16>}, {pipeline_mode = #tpu.pipeline_mode<synchronous>, transform_indices = @transform_1, window_bounds = array<i64: 32, 16>}, {pipeline_mode = #tpu.pipeline_mode<synchronous>, transform_indices = @transform_2, window_bounds = array<i64: 32, 32>}, {pipeline_mode = #tpu.pipeline_mode<synchronous>, transform_indices = @transform_3, window_bounds = array<i64: 32, 3>}, {transform_indices = @transform_4, window_bounds = array<i64: 1, 1>}, {transform_indices = @transform_5, window_bounds = array<i64: 1, 128>}]} {
    %c0 = arith.constant 0 : index
    %c0_0 = arith.constant 0 : index
    %0 = vector.load %arg1[%c0, %c0_0] : memref<128x16xf32, #tpu.memory_space<vmem>>, vector<128x16xf32>
    %c0_1 = arith.constant 0 : index
    %c0_2 = arith.constant 0 : index
    %1 = vector.load %arg4[%c0_1, %c0_2] : memref<32x3xf32, #tpu.memory_space<vmem>>, vector<32x3xf32>
    %2 = vector.extract_strided_slice %1 {offsets = [0, 0], sizes = [32, 1], strides = [1, 1]} : vector<32x3xf32> to vector<32x1xf32>
    %3 = vector.extract_strided_slice %1 {offsets = [0, 1], sizes = [32, 1], strides = [1, 1]} : vector<32x3xf32> to vector<32x1xf32>
    %4 = vector.extract_strided_slice %1 {offsets = [0, 2], sizes = [32, 1], strides = [1, 1]} : vector<32x3xf32> to vector<32x1xf32>
    %c0_3 = arith.constant 0 : index
    %c0_4 = arith.constant 0 : index
    %5 = vector.load %arg2[%c0_3, %c0_4] : memref<32x16xf32, #tpu.memory_space<vmem>>, vector<32x16xf32>
    %cst = arith.constant dense<0.000000e+00> : vector<32x128xf32>
    %6 = tpu.matmul %5, %0, %cst {dimension_numbers = #tpu.dot_dimension_numbers<[1], [1], [0], [0], [0, 0, 1, 0], [], []>} : vector<32x16xf32>, vector<128x16xf32>, vector<32x128xf32> -> vector<32x128xf32>
    %7 = vector.broadcast %2 : vector<32x1xf32> to vector<32x128xf32>
    %8 = arith.addf %6, %7 : vector<32x128xf32>
    %cst_5 = arith.constant 0.000000e+00 : f32
    %9 = vector.broadcast %cst_5 : f32 to vector<32x128xf32>
    %10 = arith.maximumf %8, %9 : vector<32x128xf32>
    %c0_6 = arith.constant 0 : index
    %c0_7 = arith.constant 0 : index
    %11 = vector.load %arg3[%c0_6, %c0_7] : memref<32x32xf32, #tpu.memory_space<vmem>>, vector<32x32xf32>
    %cst_8 = arith.constant dense<0.000000e+00> : vector<32x128xf32>
    %12 = tpu.matmul %11, %10, %cst_8 {dimension_numbers = #tpu.dot_dimension_numbers<[1], [0], [0], [1], [0, 0, 1, 1], [], []>} : vector<32x32xf32>, vector<32x128xf32>, vector<32x128xf32> -> vector<32x128xf32>
    %13 = vector.broadcast %3 : vector<32x1xf32> to vector<32x128xf32>
    %14 = arith.addf %12, %13 : vector<32x128xf32>
    %cst_9 = arith.constant 0.000000e+00 : f32
    %15 = vector.broadcast %cst_9 : f32 to vector<32x128xf32>
    %16 = arith.maximumf %14, %15 : vector<32x128xf32>
    %17 = vector.broadcast %4 : vector<32x1xf32> to vector<32x128xf32>
    %18 = arith.mulf %16, %17 : vector<32x128xf32>
    %cst_10 = arith.constant dense<0.000000e+00> : vector<128xf32>
    %19 = vector.multi_reduction <add>, %18, %cst_10 [0] : vector<32x128xf32> to vector<128xf32>
    %20 = vector.shape_cast %19 : vector<128xf32> to vector<1x128xf32>
    %c0_11 = arith.constant 0 : index
    %c0_12 = arith.constant 0 : index
    %21 = memref.load %arg5[%c0_11, %c0_12] : memref<1x1xf32, #tpu.memory_space<smem>>
    %22 = vector.broadcast %21 : f32 to vector<1x128xf32>
    %23 = arith.addf %20, %22 : vector<1x128xf32>
    %c0_13 = arith.constant 0 : index
    %c0_14 = arith.constant 0 : index
    %24 = vector.load %arg6[%c0_13, %c0_14] : memref<1x128xf32, #tpu.memory_space<vmem>>, vector<1x128xf32>
    tpu.vector_store %arg6[%c0_13, %c0_14], %23 {strides = array<i32>} : memref<1x128xf32, #tpu.memory_space<vmem>>, vector<1x128xf32>,
    return
  }
  func.func @transform_0(%arg0: i32) -> (i32, i32) {
    %c0_i32 = arith.constant 0 : i32
    %c0_i32_0 = arith.constant 0 : i32
    return %arg0, %c0_i32 : i32, i32
  }
  func.func @transform_1(%arg0: i32) -> (i32, i32) {
    %c0_i32 = arith.constant 0 : i32
    %c0_i32_0 = arith.constant 0 : i32
    %c0_i32_1 = arith.constant 0 : i32
    return %c0_i32, %c0_i32_0 : i32, i32
  }
  func.func @transform_2(%arg0: i32) -> (i32, i32) {
    %c0_i32 = arith.constant 0 : i32
    %c0_i32_0 = arith.constant 0 : i32
    %c0_i32_1 = arith.constant 0 : i32
    return %c0_i32, %c0_i32_0 : i32, i32
  }
  func.func @transform_3(%arg0: i32) -> (i32, i32) {
    %c0_i32 = arith.constant 0 : i32
    %c0_i32_0 = arith.constant 0 : i32
    %c0_i32_1 = arith.constant 0 : i32
    return %c0_i32, %c0_i32_0 : i32, i32
  }
  func.func @transform_4(%arg0: i32) -> (i32, i32) {
    %c0_i32 = arith.constant 0 : i32
    %c0_i32_0 = arith.constant 0 : i32
    %c0_i32_1 = arith.constant 0 : i32
    return %c0_i32, %c0_i32_0 : i32, i32
  }
  func.func @transform_5(%arg0: i32) -> (i32, i32) {
    %c0_i32 = arith.constant 0 : i32
    %c0_i32_0 = arith.constant 0 : i32
    return %c0_i32, %arg0 : i32, i32
  }
}

module attributes {stable_mosaic.version = 11 : i64} {
  func.func @critic_kernel(%arg0: i32, %arg1: memref<128x16xf32, #tpu.memory_space<vmem>>, %arg2: memref<32x16xf32, #tpu.memory_space<vmem>>, %arg3: memref<32x32xf32, #tpu.memory_space<vmem>>, %arg4: memref<32x3xf32, #tpu.memory_space<vmem>>, %arg5: memref<1x1xf32, #tpu.memory_space<smem>>, %arg6: memref<1x128xf32, #tpu.memory_space<vmem>>) attributes {dimension_semantics = [#tpu.dimension_semantics<parallel>], iteration_bounds = array<i64: 1>, scalar_prefetch = 0 : i64, scratch_operands = 0 : i64, tpu.core_type = #tpu.core_type<tc>, window_params = [{transform_indices = @transform_0, window_bounds = array<i64: 128, 16>}, {pipeline_mode = #tpu.pipeline_mode<synchronous>, transform_indices = @transform_1, window_bounds = array<i64: 32, 16>}, {pipeline_mode = #tpu.pipeline_mode<synchronous>, transform_indices = @transform_2, window_bounds = array<i64: 32, 32>}, {pipeline_mode = #tpu.pipeline_mode<synchronous>, transform_indices = @transform_3, window_bounds = array<i64: 32, 3>}, {transform_indices = @transform_4, window_bounds = array<i64: 1, 1>}, {transform_indices = @transform_5, window_bounds = array<i64: 1, 128>}]} {
    %c0 = arith.constant 0 : index
    %c0_0 = arith.constant 0 : index
    %0 = vector.load %arg1[%c0, %c0_0] : memref<128x16xf32, #tpu.memory_space<vmem>>, vector<128x16xf32>
    %c0_1 = arith.constant 0 : index
    %c0_2 = arith.constant 0 : index
    %1 = vector.load %arg4[%c0_1, %c0_2] : memref<32x3xf32, #tpu.memory_space<vmem>>, vector<32x3xf32>
    %2 = vector.extract_strided_slice %1 {offsets = [0, 0], sizes = [32, 1], strides = [1, 1]} : vector<32x3xf32> to vector<32x1xf32>
    %3 = vector.extract_strided_slice %1 {offsets = [0, 1], sizes = [32, 1], strides = [1, 1]} : vector<32x3xf32> to vector<32x1xf32>
    %4 = vector.extract_strided_slice %1 {offsets = [0, 2], sizes = [32, 1], strides = [1, 1]} : vector<32x3xf32> to vector<32x1xf32>
    %c0_3 = arith.constant 0 : index
    %c0_4 = arith.constant 0 : index
    %5 = vector.load %arg2[%c0_3, %c0_4] : memref<32x16xf32, #tpu.memory_space<vmem>>, vector<32x16xf32>
    %cst = arith.constant dense<0.000000e+00> : vector<32x128xf32>
    %6 = tpu.matmul %5, %0, %cst {dimension_numbers = #tpu.dot_dimension_numbers<[1], [1], [0], [0], [0, 0, 1, 0], [], []>} : vector<32x16xf32>, vector<128x16xf32>, vector<32x128xf32> -> vector<32x128xf32>
    %7 = vector.broadcast %2 : vector<32x1xf32> to vector<32x128xf32>
    %8 = arith.addf %6, %7 : vector<32x128xf32>
    %cst_5 = arith.constant 0.000000e+00 : f32
    %9 = vector.broadcast %cst_5 : f32 to vector<32x128xf32>
    %10 = arith.maximumf %8, %9 : vector<32x128xf32>
    %c0_6 = arith.constant 0 : index
    %c0_7 = arith.constant 0 : index
    %11 = vector.load %arg3[%c0_6, %c0_7] : memref<32x32xf32, #tpu.memory_space<vmem>>, vector<32x32xf32>
    %cst_8 = arith.constant dense<0.000000e+00> : vector<32x128xf32>
    %12 = tpu.matmul %11, %10, %cst_8 {dimension_numbers = #tpu.dot_dimension_numbers<[1], [0], [0], [1], [0, 0, 1, 1], [], []>} : vector<32x32xf32>, vector<32x128xf32>, vector<32x128xf32> -> vector<32x128xf32>
    %13 = vector.broadcast %3 : vector<32x1xf32> to vector<32x128xf32>
    %14 = arith.addf %12, %13 : vector<32x128xf32>
    %cst_9 = arith.constant 0.000000e+00 : f32
    %15 = vector.broadcast %cst_9 : f32 to vector<32x128xf32>
    %16 = arith.maximumf %14, %15 : vector<32x128xf32>
    %17 = vector.broadcast %4 : vector<32x1xf32> to vector<32x128xf32>
    %18 = arith.mulf %16, %17 : vector<32x128xf32>
    %cst_10 = arith.constant dense<0.000000e+00> : vector<128xf32>
    %19 = vector.multi_reduction <add>, %18, %cst_10 [0] : vector<32x128xf32> to vector<128xf32>
    %20 = vector.shape_cast %19 : vector<128xf32> to vector<1x128xf32>
    %c0_11 = arith.constant 0 : index
    %c0_12 = arith.constant 0 : index
    %21 = memref.load %arg5[%c0_11, %c0_12] : memref<1x1xf32, #tpu.memory_space<smem>>
    %22 = vector.broadcast %21 : f32 to vector<1x128xf32>
    %23 = arith.addf %20, %22 : vector<1x128xf32>
    %c0_13 = arith.constant 0 : index
    %c0_14 = arith.constant 0 : index
    %24 = vector.load %arg6[%c0_13, %c0_14] : memref<1x128xf32, #tpu.memory_space<vmem>>, vector<1x128xf32>
    tpu.vector_store %arg6[%c0_13, %c0_14], %23 {strides = array<i32>} : memref<1x128xf32, #tpu.memory_space<vmem>>, vector<1x128xf32>,
    return
  }
  func.func @transform_0(%arg0: i32) -> (i32, i32) {
    %c0_i32 = arith.constant 0 : i32
    %c0_i32_0 = arith.constant 0 : i32
    return %arg0, %c0_i32 : i32, i32
  }
  func.func @transform_1(%arg0: i32) -> (i32, i32) {
    %c0_i32 = arith.constant 0 : i32
    %c0_i32_0 = arith.constant 0 : i32
    %c0_i32_1 = arith.constant 0 : i32
    return %c0_i32, %c0_i32_0 : i32, i32
  }
  func.func @transform_2(%arg0: i32) -> (i32, i32) {
    %c0_i32 = arith.constant 0 : i32
    %c0_i32_0 = arith.constant 0 : i32
    %c0_i32_1 = arith.constant 0 : i32
    return %c0_i32, %c0_i32_0 : i32, i32
  }
  func.func @transform_3(%arg0: i32) -> (i32, i32) {
    %c0_i32 = arith.constant 0 : i32
    %c0_i32_0 = arith.constant 0 : i32
    %c0_i32_1 = arith.constant 0 : i32
    return %c0_i32, %c0_i32_0 : i32, i32
  }
  func.func @transform_4(%arg0: i32) -> (i32, i32) {
    %c0_i32 = arith.constant 0 : i32
    %c0_i32_0 = arith.constant 0 : i32
    %c0_i32_1 = arith.constant 0 : i32
    return %c0_i32, %c0_i32_0 : i32, i32
  }
  func.func @transform_5(%arg0: i32) -> (i32, i32) {
    %c0_i32 = arith.constant 0 : i32
    %c0_i32_0 = arith.constant 0 : i32
    return %c0_i32, %arg0 : i32, i32
  }
}

</mosaic_0001>

<bundles_post_ra>
// kernel: tpu_custom_call.1
= control target key start
LH: loop header
LB: loop body
LE: loop exit
PB: predicated region body
PF: predicated region fallthrough
CT: control target
= control target key end

     0   :  { %vm66_vm0 = vcmask 130048   ;;  %s550_s0 = inlined_call_operand.vmem [shape: f32[128,16], index: 0, kind: input, shape index: {}]   ;;  %s551_s1 = inlined_call_operand.vmem [shape: f32[32,16], index: 1, kind: input, shape index: {}]   ;;  %s552_s2 = inlined_call_operand.vmem [shape: f32[32,32], index: 2, kind: input, shape index: {}]   ;;  %s553_s3 = inlined_call_operand.vmem [shape: f32[32,3], index: 3, kind: input, shape index: {}]   ;;  %s554_s4 = inlined_call_operand.<no memory space> [shape: f32[1,1], index: 4, kind: input, shape index: {}]   ;;  %s555_s5 = inlined_call_operand.hbm [shape: f32[1,128], index: 5, kind: output, shape index: {}]  }
   0x1   :  { %v37_v0 = vld [vmem:[%s550_s0 + $0x78] sm:$0xff]  ;;  %v36_v1 = vld [vmem:[%s550_s0 + $0x70] sm:$0xff] }
   0x2   :  { %300 = vmatpush.xpose.msk.msra.mxu3 %vm66_vm0, %v37_v0  ;;  %299 = vmatpush.xpose.msk.msra.mxu2 %vm66_vm0, %v37_v0 }
   0x3   :  { %275 = vmatpush.xpose.msk.msra.mxu0 %vm66_vm0, %v37_v0 }
   0x4   :  { %11 = vsyncpa [#allocation4], 0  ;;  %v35_v2 = vld [vmem:[%s550_s0 + $0x68] sm:$0xff]  ;;  %v34_v3 = vld [vmem:[%s550_s0 + $0x60] sm:$0xff]  ;;  %v369_v10 = vmov 0   ;;  %v370_v26 = vmov 1  }
   0x5   :  { %v33_v4 = vld [vmem:[%s550_s0 + $0x58] sm:$0xff]  ;;  %v32_v5 = vld [vmem:[%s550_s0 + $0x50] sm:$0xff]  ;;  %v31_v6 = vld [vmem:[%s550_s0 + $0x48] sm:$0xff]  ;;  %335 = vset.pattern.permute.xlu0 %v369_v10  ;;  %336 = vset.pattern.permute.xlu1 %v369_v10  ;;  %v371_v30 = vmov 2   ;;  %vm180_vm1 = vcmask 261120   ;;  %s372_s22 = smov [#allocation3]  }
   0x6   :  { %302 = vmatpush.xpose.msk.msra.mxu3 %vm66_vm0, %v36_v1  ;;  %301 = vmatpush.xpose.msk.msra.mxu2 %vm66_vm0, %v36_v1  ;;  %v30_v7 = vld [vmem:[%s550_s0 + $0x40] sm:$0xff]  ;;  %v29_v8 = vld [vmem:[%s550_s0 + $0x38] sm:$0xff]  ;;  %v28_v9 = vld [vmem:[%s550_s0 + $0x30] sm:$0xff]  ;;  %s264_s23 = sshll.u32 %s372_s22, 4  ;;  %s266_s26 = sshll.u32 %s555_s5, 4  ;;  %s265_s23 = int_to_ptr.vmem [resolvable:$true] %s264_s23  ;;  %s267_s26 = int_to_ptr.hbm [resolvable:$true] %s266_s26 }
   0x7   :  { %276 = vmatpush.xpose.msk.msra.mxu0 %vm66_vm0, %v36_v1  ;;  %v27_v11 = vld [vmem:[%s550_s0 + $0x28] sm:$0xff]  ;;  %v41_v12 = vld [vmem:[%s553_s3 + $0x18] sm:$0xff]  ;;  %v26_v14 = vld [vmem:[%s550_s0 + $0x20] sm:$0xff]  ;;  %337 = vset.pattern.permute.xlu2 %v370_v26 }
   0x8   :  { %v39_v13 = vld [vmem:[%s553_s3 + $0x8] sm:$0xff]  ;;  %63 = vperm.xlu0 %335, %v41_v12   ;;  %v25_v15 = vld [vmem:[%s550_s0 + $0x18] sm:$0xff]  ;;  %v487_v16 = vld [vmem:[%s553_s3 + $0x10] sm:$0xff] }
   0x9   :  { %53 = vperm.xlu1 %336, %v39_v13   ;;  %v38_v17 = vld [vmem:[%s553_s3] sm:$0xff]  ;;  %v24_v18 = vld [vmem:[%s550_s0 + $0x10] sm:$0xff]  ;;  %v23_v19 = vld [vmem:[%s550_s0 + $0x8] sm:$0xff] }
   0xa   :  { %304 = vmatpush.xpose.msk.msra.mxu3 %vm66_vm0, %v35_v2  ;;  %303 = vmatpush.xpose.msk.msra.mxu2 %vm66_vm0, %v35_v2  ;;  %v22_v20 = vld [vmem:[%s550_s0] sm:$0xff]  ;;  %v44_v21 = vld [vmem:[%s551_s1 + $0x10] sm:$0xff]  ;;  %v43_v22 = vld [vmem:[%s551_s1 + $0x8] sm:$0xff] }
   0xb   :  { %277 = vmatpush.xpose.msk.msra.mxu0 %vm66_vm0, %v35_v2  ;;  %v42_v23 = vld [vmem:[%s551_s1] sm:$0xff]  ;;  %v45_v24 = vld [vmem:[%s551_s1 + $0x18] sm:$0xff]  ;;  %165 = vperm.xlu2 %337, %v38_v17   ;;  %v161_v44 = vld [vmem:[%s552_s2 + $0x8] sm:$0xff] }
   0xc   :  { %v160_v43 = vld [vmem:[%s552_s2] sm:$0xff]  ;;  %v162_v45 = vld [vmem:[%s552_s2 + $0x10] sm:$0xff]  ;;  %v163_v46 = vld [vmem:[%s552_s2 + $0x18] sm:$0xff] }
   0xe   :  { %306 = vmatpush.xpose.msk.msra.mxu3 %vm66_vm0, %v34_v3  ;;  %305 = vmatpush.xpose.msk.msra.mxu2 %vm66_vm0, %v34_v3 }
   0xf   :  { %278 = vmatpush.xpose.msk.msra.mxu0 %vm66_vm0, %v34_v3 }
  0x10   :  { %58 = vperm.xlu0 %335, %v487_v16  }
  0x11   :  { %48 = vperm.xlu1 %336, %v38_v17  }
  0x12   :  { %308 = vmatpush.xpose.msk.msra.mxu3 %vm66_vm0, %v33_v4  ;;  %307 = vmatpush.xpose.msk.msra.mxu2 %vm66_vm0, %v33_v4 }
  0x13   :  { %279 = vmatpush.xpose.msk.msra.mxu0 %vm66_vm0, %v33_v4  ;;  %169 = vperm.xlu2 %337, %v39_v13  }
  0x16   :  { %310 = vmatpush.xpose.msk.msra.mxu3 %vm66_vm0, %v32_v5  ;;  %309 = vmatpush.xpose.msk.msra.mxu2 %vm66_vm0, %v32_v5 }
  0x17   :  { %280 = vmatpush.xpose.msk.msra.mxu0 %vm66_vm0, %v32_v5 }
  0x18   :  { %338 = vset.pattern.permute.xlu0 %v370_v26 }
  0x19   :  { %339 = vset.pattern.permute.xlu1 %v370_v26  ;;  %173 = vperm.xlu0 %338, %v487_v16  }
  0x1a   :  { %312 = vmatpush.xpose.msk.msra.mxu3 %vm66_vm0, %v31_v6  ;;  %311 = vmatpush.xpose.msk.msra.mxu2 %vm66_vm0, %v31_v6 }
  0x1b   :  { %281 = vmatpush.xpose.msk.msra.mxu0 %vm66_vm0, %v31_v6  ;;  %177 = vperm.xlu1 %339, %v41_v12  }
  0x1c   :  { %340 = vset.pattern.permute.xlu2 %v371_v30 }
  0x1d   :  { %227 = vperm.xlu2 %340, %v38_v17  }
  0x1e   :  { %314 = vmatpush.xpose.msk.msra.mxu3 %vm66_vm0, %v30_v7  ;;  %313 = vmatpush.xpose.msk.msra.mxu2 %vm66_vm0, %v30_v7 }
  0x1f   :  { %282 = vmatpush.xpose.msk.msra.mxu0 %vm66_vm0, %v30_v7 }
  0x21   :  { %342 = vset.pattern.permute.xlu0 %v371_v30 }
  0x22   :  { %316 = vmatpush.xpose.msk.msra.mxu3 %vm66_vm0, %v29_v8  ;;  %315 = vmatpush.xpose.msk.msra.mxu2 %vm66_vm0, %v29_v8 }
  0x23   :  { %283 = vmatpush.xpose.msk.msra.mxu0 %vm66_vm0, %v29_v8  ;;  %341 = vset.pattern.permute.xlu1 %v371_v30 }
  0x24   :  { %231 = vperm.xlu1 %341, %v39_v13   ;;  %239 = vperm.xlu0 %342, %v41_v12  }
  0x25   :  { %235 = vperm.xlu2 %340, %v487_v16  }
  0x26   :  { %318 = vmatpush.xpose.msk.msra.mxu3 %vm66_vm0, %v28_v9  ;;  %317 = vmatpush.xpose.msk.msra.mxu2 %vm66_vm0, %v28_v9 }
  0x27   :  { %284 = vmatpush.xpose.msk.msra.mxu0 %vm66_vm0, %v28_v9 }
  0x2a   :  { %320 = vmatpush.xpose.msk.msra.mxu3 %vm66_vm0, %v27_v11  ;;  %319 = vmatpush.xpose.msk.msra.mxu2 %vm66_vm0, %v27_v11 }
  0x2b   :  { %285 = vmatpush.xpose.msk.msra.mxu0 %vm66_vm0, %v27_v11 }
  0x2e   :  { %322 = vmatpush.xpose.msk.msra.mxu3 %vm66_vm0, %v26_v14  ;;  %321 = vmatpush.xpose.msk.msra.mxu2 %vm66_vm0, %v26_v14 }
  0x2f   :  { %286 = vmatpush.xpose.msk.msra.mxu0 %vm66_vm0, %v26_v14 }
  0x32   :  { %324 = vmatpush.xpose.msk.msra.mxu3 %vm66_vm0, %v25_v15  ;;  %323 = vmatpush.xpose.msk.msra.mxu2 %vm66_vm0, %v25_v15 }
  0x33   :  { %287 = vmatpush.xpose.msk.msra.mxu0 %vm66_vm0, %v25_v15  ;;  %v256_v15 = vstv %s554_s4 }
  0x36   :  { %326 = vmatpush.xpose.msk.msra.mxu3 %vm66_vm0, %v24_v18  ;;  %325 = vmatpush.xpose.msk.msra.mxu2 %vm66_vm0, %v24_v18 }
  0x37   :  { %288 = vmatpush.xpose.msk.msra.mxu0 %vm66_vm0, %v24_v18 }
  0x3a   :  { %328 = vmatpush.xpose.msk.msra.mxu3 %vm66_vm0, %v23_v19  ;;  %327 = vmatpush.xpose.msk.msra.mxu2 %vm66_vm0, %v23_v19 }
  0x3b   :  { %289 = vmatpush.xpose.msk.msra.mxu0 %vm66_vm0, %v23_v19 }
  0x3e   :  { %330 = vmatpush.xpose.msk.msra.mxu3 %vm66_vm0, %v22_v20  ;;  %329 = vmatpush.xpose.msk.msra.mxu2 %vm66_vm0, %v22_v20 }
  0x3f   :  { %290 = vmatpush.xpose.msk.msra.mxu0 %vm66_vm0, %v22_v20 }
  0x41   :  { %293 = vmatmul.msk.f32.vlgmr.msra.gmra.mxu3 %vm66_vm0, %v44_v21  ;;  %292 = vmatmul.msk.f32.vlgmr.msra.gmra.mxu2 %vm66_vm0, %v43_v22 }
  0x42   :  { %291 = vmatmul.msk.f32.vlgmr.msra.gmra.mxu0 %vm66_vm0, %v42_v23 }
  0x49   :  { %294 = vmatmul.msk.f32.gmra.mxu3 %vm66_vm0, %v45_v24 }
  0x65   :  { %v166_v47 = vpop.permute.xlu2 %165 }
  0x6d   :  { %v170_v49 = vpop.permute.xlu2 %169 }
  0x77   :  { %v228_v54 = vpop.permute.xlu2 %227 }
  0x7a   :  { %v64_v25 = vpop.permute.xlu0 %63 }
  0x7b   :  { %v54_v27 = vpop.permute.xlu1 %53 }
  0x7f   :  { %v236_v63 = vpop.permute.xlu2 %235 }
  0x82   :  { %v59_v29 = vpop.permute.xlu0 %58 }
  0x83   :  { %v49_v35 = vpop.permute.xlu1 %48 }
  0x8b   :  { %v174_v52 = vpop.permute.xlu0 %173 }
  0x8d   :  { %v178_v51 = vpop.permute.xlu1 %177 }
  0x96   :  { %v232_v59 = vpop.permute.xlu1 %231  ;;  %v240_v4 = vpop.permute.xlu0 %239 }
  0xbf   :  { %v144_v36 = vpop.f32.mrf.mxu0 }
  0xc0   :  { %v145_v40 = vadd.f32 %v144_v36, %v49_v35 }
  0xc2   :  { %v156_v42 = vmax.f32 %v145_v40, 0.0 }
  0xc4   :  { %v150_v28 = vpop.f32.mrf.mxu3  ;;  %v147_v31 = vpop.f32.mrf.mxu2 }
  0xc5   :  { %v151_v33 = vadd.f32 %v150_v28, %v59_v29  ;;  %v148_v37 = vadd.f32 %v147_v31, %v54_v27 }
  0xc7   :  { %v158_v39 = vmax.f32 %v151_v33, 0.0  ;;  %v157_v41 = vmax.f32 %v148_v37, 0.0 }
  0xcc   :  { %v153_v32 = vpop.f32.mrf.mxu3 }
  0xcd   :  { %v154_v34 = vadd.f32 %v153_v32, %v64_v25 }
  0xcf   :  { %v159_v38 = vmax.f32 %v154_v34, 0.0 }
  0xd1   :  { %205 = vmatpush.msra.mxu1 %v159_v38 }
  0xd3   :  { %206 = vmatpush.msra.mxu1 %v158_v39 }
  0xd5   :  { %207 = vmatpush.msra.mxu1 %v157_v41 }
  0xd7   :  { %208 = vmatpush.msra.mxu1 %v156_v42 }
  0xd8   :  { %295 = vmatmul.msk.f32.vlgmr.msra.gmra.mxu1 %vm180_vm1, %v160_v43 }
  0xe0   :  { %296 = vmatmul.msk.f32.gmra.mxu1 %vm180_vm1, %v161_v44 }
  0xe8   :  { %297 = vmatmul.msk.f32.gmra.mxu1 %vm180_vm1, %v162_v45 }
  0xf0   :  { %298 = vmatmul.msk.f32.gmra.mxu1 %vm180_vm1, %v163_v46 }
 0x155   :  { %v210_v48 = vpop.f32.mrf.mxu1 }
 0x156   :  { %v211_v56 = vadd.f32 %v210_v48, %v166_v47 }
 0x158   :  { %v222_v60 = vmax.f32 %v211_v56, 0.0 }
 0x15a   :  { %v242_v1 = vmul.f32 %v228_v54, %v222_v60 }
 0x15d   :  { %v213_v50 = vpop.f32.mrf.mxu1 }
 0x15e   :  { %v214_v53 = vadd.f32 %v213_v50, %v170_v49 }
 0x160   :  { %v223_v58 = vmax.f32 %v214_v53, 0.0 }
 0x162   :  { %v243_v62 = vmul.f32 %v232_v59, %v223_v58 }
 0x164   :  { %v246_v5 = vadd.f32 %v243_v62, %v242_v1 }
 0x165   :  { %v216_v55 = vpop.f32.mrf.mxu1 }
 0x166   :  { %v217_v57 = vadd.f32 %v216_v55, %v174_v52 }
 0x168   :  { %v224_v61 = vmax.f32 %v217_v57, 0.0 }
 0x16a   :  { %v244_v2 = vmul.f32 %v236_v63, %v224_v61 }
 0x16c   :  { %v247_v7 = vadd.f32 %v246_v5, %v244_v2 }
 0x16d   :  { %v219_v0 = vpop.f32.mrf.mxu1 }
 0x16e   :  { %v220_v3 = vadd.f32 %v219_v0, %v178_v51 }
 0x170   :  { %v225_v6 = vmax.f32 %v220_v3, 0.0 }
 0x172   :  { %v245_v8 = vmul.f32 %v240_v4, %v225_v6 }
 0x174   :  { %v248_v9 = vadd.f32 %v247_v7, %v245_v8 }
 0x176   :  { %v249_v10 = vrot.slane %v248_v9, 4 }
 0x178   :  { %v250_v11 = vadd.f32 %v249_v10, %v248_v9 }
 0x17a   :  { %v251_v12 = vrot.slane %v250_v11, 2 }
 0x17c   :  { %v252_v13 = vadd.f32 %v251_v12, %v250_v11 }
 0x17e   :  { %v253_v14 = vrot.slane %v252_v13, 1 }
 0x180   :  { %v254_v16 = vadd.f32 %v253_v14, %v252_v13 }
 0x182   :  { %v257_v17 = vadd.f32 %v256_v15, %v254_v16 }
 0x184   :  { %258 = vst [vmem:[#allocation3] sm:$0x1] %v257_v17 }
 0x185   :  { %269 = dma.vmem_to_hbm [thread:$0]  %s265_s23, 16, %s267_s26, [#allocation4]  }
 0x186   :  { %367 = dma.done.wait [#allocation4], 16  }
 0x187   :  { %368 = vsyncadd [#allocation4], 4294967280 }
 0x188   :  { %274 = vsyncpa [#allocation4], 1 }

// kernel: tpu_custom_call.1
= control target key start
LH: loop header
LB: loop body
LE: loop exit
PB: predicated region body
PF: predicated region fallthrough
CT: control target
= control target key end

     0   :  { %vm66_vm0 = vcmask 130048   ;;  %s550_s0 = inlined_call_operand.vmem [shape: f32[128,16], index: 0, kind: input, shape index: {}]   ;;  %s551_s1 = inlined_call_operand.vmem [shape: f32[32,16], index: 1, kind: input, shape index: {}]   ;;  %s552_s2 = inlined_call_operand.vmem [shape: f32[32,32], index: 2, kind: input, shape index: {}]   ;;  %s553_s3 = inlined_call_operand.vmem [shape: f32[32,3], index: 3, kind: input, shape index: {}]   ;;  %s554_s4 = inlined_call_operand.<no memory space> [shape: f32[1,1], index: 4, kind: input, shape index: {}]   ;;  %s555_s5 = inlined_call_operand.hbm [shape: f32[1,128], index: 5, kind: output, shape index: {}]  }
   0x1   :  { %v37_v0 = vld [vmem:[%s550_s0 + $0x78] sm:$0xff]  ;;  %v36_v1 = vld [vmem:[%s550_s0 + $0x70] sm:$0xff] }
   0x2   :  { %300 = vmatpush.xpose.msk.msra.mxu3 %vm66_vm0, %v37_v0  ;;  %299 = vmatpush.xpose.msk.msra.mxu2 %vm66_vm0, %v37_v0 }
   0x3   :  { %275 = vmatpush.xpose.msk.msra.mxu0 %vm66_vm0, %v37_v0 }
   0x4   :  { %11 = vsyncpa [#allocation4], 0  ;;  %v35_v2 = vld [vmem:[%s550_s0 + $0x68] sm:$0xff]  ;;  %v34_v3 = vld [vmem:[%s550_s0 + $0x60] sm:$0xff]  ;;  %v369_v10 = vmov 0   ;;  %v370_v26 = vmov 1  }
   0x5   :  { %v33_v4 = vld [vmem:[%s550_s0 + $0x58] sm:$0xff]  ;;  %v32_v5 = vld [vmem:[%s550_s0 + $0x50] sm:$0xff]  ;;  %v31_v6 = vld [vmem:[%s550_s0 + $0x48] sm:$0xff]  ;;  %335 = vset.pattern.permute.xlu0 %v369_v10  ;;  %336 = vset.pattern.permute.xlu1 %v369_v10  ;;  %v371_v30 = vmov 2   ;;  %vm180_vm1 = vcmask 261120   ;;  %s372_s22 = smov [#allocation3]  }
   0x6   :  { %302 = vmatpush.xpose.msk.msra.mxu3 %vm66_vm0, %v36_v1  ;;  %301 = vmatpush.xpose.msk.msra.mxu2 %vm66_vm0, %v36_v1  ;;  %v30_v7 = vld [vmem:[%s550_s0 + $0x40] sm:$0xff]  ;;  %v29_v8 = vld [vmem:[%s550_s0 + $0x38] sm:$0xff]  ;;  %v28_v9 = vld [vmem:[%s550_s0 + $0x30] sm:$0xff]  ;;  %s264_s23 = sshll.u32 %s372_s22, 4  ;;  %s266_s26 = sshll.u32 %s555_s5, 4  ;;  %s265_s23 = int_to_ptr.vmem [resolvable:$true] %s264_s23  ;;  %s267_s26 = int_to_ptr.hbm [resolvable:$true] %s266_s26 }
   0x7   :  { %276 = vmatpush.xpose.msk.msra.mxu0 %vm66_vm0, %v36_v1  ;;  %v27_v11 = vld [vmem:[%s550_s0 + $0x28] sm:$0xff]  ;;  %v41_v12 = vld [vmem:[%s553_s3 + $0x18] sm:$0xff]  ;;  %v26_v14 = vld [vmem:[%s550_s0 + $0x20] sm:$0xff]  ;;  %337 = vset.pattern.permute.xlu2 %v370_v26 }
   0x8   :  { %v39_v13 = vld [vmem:[%s553_s3 + $0x8] sm:$0xff]  ;;  %63 = vperm.xlu0 %335, %v41_v12   ;;  %v25_v15 = vld [vmem:[%s550_s0 + $0x18] sm:$0xff]  ;;  %v487_v16 = vld [vmem:[%s553_s3 + $0x10] sm:$0xff] }
   0x9   :  { %53 = vperm.xlu1 %336, %v39_v13   ;;  %v38_v17 = vld [vmem:[%s553_s3] sm:$0xff]  ;;  %v24_v18 = vld [vmem:[%s550_s0 + $0x10] sm:$0xff]  ;;  %v23_v19 = vld [vmem:[%s550_s0 + $0x8] sm:$0xff] }
   0xa   :  { %304 = vmatpush.xpose.msk.msra.mxu3 %vm66_vm0, %v35_v2  ;;  %303 = vmatpush.xpose.msk.msra.mxu2 %vm66_vm0, %v35_v2  ;;  %v22_v20 = vld [vmem:[%s550_s0] sm:$0xff]  ;;  %v44_v21 = vld [vmem:[%s551_s1 + $0x10] sm:$0xff]  ;;  %v43_v22 = vld [vmem:[%s551_s1 + $0x8] sm:$0xff] }
   0xb   :  { %277 = vmatpush.xpose.msk.msra.mxu0 %vm66_vm0, %v35_v2  ;;  %v42_v23 = vld [vmem:[%s551_s1] sm:$0xff]  ;;  %v45_v24 = vld [vmem:[%s551_s1 + $0x18] sm:$0xff]  ;;  %165 = vperm.xlu2 %337, %v38_v17   ;;  %v161_v44 = vld [vmem:[%s552_s2 + $0x8] sm:$0xff] }
   0xc   :  { %v160_v43 = vld [vmem:[%s552_s2] sm:$0xff]  ;;  %v162_v45 = vld [vmem:[%s552_s2 + $0x10] sm:$0xff]  ;;  %v163_v46 = vld [vmem:[%s552_s2 + $0x18] sm:$0xff] }
   0xe   :  { %306 = vmatpush.xpose.msk.msra.mxu3 %vm66_vm0, %v34_v3  ;;  %305 = vmatpush.xpose.msk.msra.mxu2 %vm66_vm0, %v34_v3 }
   0xf   :  { %278 = vmatpush.xpose.msk.msra.mxu0 %vm66_vm0, %v34_v3 }
  0x10   :  { %58 = vperm.xlu0 %335, %v487_v16  }
  0x11   :  { %48 = vperm.xlu1 %336, %v38_v17  }
  0x12   :  { %308 = vmatpush.xpose.msk.msra.mxu3 %vm66_vm0, %v33_v4  ;;  %307 = vmatpush.xpose.msk.msra.mxu2 %vm66_vm0, %v33_v4 }
  0x13   :  { %279 = vmatpush.xpose.msk.msra.mxu0 %vm66_vm0, %v33_v4  ;;  %169 = vperm.xlu2 %337, %v39_v13  }
  0x16   :  { %310 = vmatpush.xpose.msk.msra.mxu3 %vm66_vm0, %v32_v5  ;;  %309 = vmatpush.xpose.msk.msra.mxu2 %vm66_vm0, %v32_v5 }
  0x17   :  { %280 = vmatpush.xpose.msk.msra.mxu0 %vm66_vm0, %v32_v5 }
  0x18   :  { %338 = vset.pattern.permute.xlu0 %v370_v26 }
  0x19   :  { %339 = vset.pattern.permute.xlu1 %v370_v26  ;;  %173 = vperm.xlu0 %338, %v487_v16  }
  0x1a   :  { %312 = vmatpush.xpose.msk.msra.mxu3 %vm66_vm0, %v31_v6  ;;  %311 = vmatpush.xpose.msk.msra.mxu2 %vm66_vm0, %v31_v6 }
  0x1b   :  { %281 = vmatpush.xpose.msk.msra.mxu0 %vm66_vm0, %v31_v6  ;;  %177 = vperm.xlu1 %339, %v41_v12  }
  0x1c   :  { %340 = vset.pattern.permute.xlu2 %v371_v30 }
  0x1d   :  { %227 = vperm.xlu2 %340, %v38_v17  }
  0x1e   :  { %314 = vmatpush.xpose.msk.msra.mxu3 %vm66_vm0, %v30_v7  ;;  %313 = vmatpush.xpose.msk.msra.mxu2 %vm66_vm0, %v30_v7 }
  0x1f   :  { %282 = vmatpush.xpose.msk.msra.mxu0 %vm66_vm0, %v30_v7 }
  0x21   :  { %342 = vset.pattern.permute.xlu0 %v371_v30 }
  0x22   :  { %316 = vmatpush.xpose.msk.msra.mxu3 %vm66_vm0, %v29_v8  ;;  %315 = vmatpush.xpose.msk.msra.mxu2 %vm66_vm0, %v29_v8 }
  0x23   :  { %283 = vmatpush.xpose.msk.msra.mxu0 %vm66_vm0, %v29_v8  ;;  %341 = vset.pattern.permute.xlu1 %v371_v30 }
  0x24   :  { %231 = vperm.xlu1 %341, %v39_v13   ;;  %239 = vperm.xlu0 %342, %v41_v12  }
  0x25   :  { %235 = vperm.xlu2 %340, %v487_v16  }
  0x26   :  { %318 = vmatpush.xpose.msk.msra.mxu3 %vm66_vm0, %v28_v9  ;;  %317 = vmatpush.xpose.msk.msra.mxu2 %vm66_vm0, %v28_v9 }
  0x27   :  { %284 = vmatpush.xpose.msk.msra.mxu0 %vm66_vm0, %v28_v9 }
  0x2a   :  { %320 = vmatpush.xpose.msk.msra.mxu3 %vm66_vm0, %v27_v11  ;;  %319 = vmatpush.xpose.msk.msra.mxu2 %vm66_vm0, %v27_v11 }
  0x2b   :  { %285 = vmatpush.xpose.msk.msra.mxu0 %vm66_vm0, %v27_v11 }
  0x2e   :  { %322 = vmatpush.xpose.msk.msra.mxu3 %vm66_vm0, %v26_v14  ;;  %321 = vmatpush.xpose.msk.msra.mxu2 %vm66_vm0, %v26_v14 }
  0x2f   :  { %286 = vmatpush.xpose.msk.msra.mxu0 %vm66_vm0, %v26_v14 }
  0x32   :  { %324 = vmatpush.xpose.msk.msra.mxu3 %vm66_vm0, %v25_v15  ;;  %323 = vmatpush.xpose.msk.msra.mxu2 %vm66_vm0, %v25_v15 }
  0x33   :  { %287 = vmatpush.xpose.msk.msra.mxu0 %vm66_vm0, %v25_v15  ;;  %v256_v15 = vstv %s554_s4 }
  0x36   :  { %326 = vmatpush.xpose.msk.msra.mxu3 %vm66_vm0, %v24_v18  ;;  %325 = vmatpush.xpose.msk.msra.mxu2 %vm66_vm0, %v24_v18 }
  0x37   :  { %288 = vmatpush.xpose.msk.msra.mxu0 %vm66_vm0, %v24_v18 }
  0x3a   :  { %328 = vmatpush.xpose.msk.msra.mxu3 %vm66_vm0, %v23_v19  ;;  %327 = vmatpush.xpose.msk.msra.mxu2 %vm66_vm0, %v23_v19 }
  0x3b   :  { %289 = vmatpush.xpose.msk.msra.mxu0 %vm66_vm0, %v23_v19 }
  0x3e   :  { %330 = vmatpush.xpose.msk.msra.mxu3 %vm66_vm0, %v22_v20  ;;  %329 = vmatpush.xpose.msk.msra.mxu2 %vm66_vm0, %v22_v20 }
  0x3f   :  { %290 = vmatpush.xpose.msk.msra.mxu0 %vm66_vm0, %v22_v20 }
  0x41   :  { %293 = vmatmul.msk.f32.vlgmr.msra.gmra.mxu3 %vm66_vm0, %v44_v21  ;;  %292 = vmatmul.msk.f32.vlgmr.msra.gmra.mxu2 %vm66_vm0, %v43_v22 }
  0x42   :  { %291 = vmatmul.msk.f32.vlgmr.msra.gmra.mxu0 %vm66_vm0, %v42_v23 }
  0x49   :  { %294 = vmatmul.msk.f32.gmra.mxu3 %vm66_vm0, %v45_v24 }
  0x65   :  { %v166_v47 = vpop.permute.xlu2 %165 }
  0x6d   :  { %v170_v49 = vpop.permute.xlu2 %169 }
  0x77   :  { %v228_v54 = vpop.permute.xlu2 %227 }
  0x7a   :  { %v64_v25 = vpop.permute.xlu0 %63 }
  0x7b   :  { %v54_v27 = vpop.permute.xlu1 %53 }
  0x7f   :  { %v236_v63 = vpop.permute.xlu2 %235 }
  0x82   :  { %v59_v29 = vpop.permute.xlu0 %58 }
  0x83   :  { %v49_v35 = vpop.permute.xlu1 %48 }
  0x8b   :  { %v174_v52 = vpop.permute.xlu0 %173 }
  0x8d   :  { %v178_v51 = vpop.permute.xlu1 %177 }
  0x96   :  { %v232_v59 = vpop.permute.xlu1 %231  ;;  %v240_v4 = vpop.permute.xlu0 %239 }
  0xbf   :  { %v144_v36 = vpop.f32.mrf.mxu0 }
  0xc0   :  { %v145_v40 = vadd.f32 %v144_v36, %v49_v35 }
  0xc2   :  { %v156_v42 = vmax.f32 %v145_v40, 0.0 }
  0xc4   :  { %v150_v28 = vpop.f32.mrf.mxu3  ;;  %v147_v31 = vpop.f32.mrf.mxu2 }
  0xc5   :  { %v151_v33 = vadd.f32 %v150_v28, %v59_v29  ;;  %v148_v37 = vadd.f32 %v147_v31, %v54_v27 }
  0xc7   :  { %v158_v39 = vmax.f32 %v151_v33, 0.0  ;;  %v157_v41 = vmax.f32 %v148_v37, 0.0 }
  0xcc   :  { %v153_v32 = vpop.f32.mrf.mxu3 }
  0xcd   :  { %v154_v34 = vadd.f32 %v153_v32, %v64_v25 }
  0xcf   :  { %v159_v38 = vmax.f32 %v154_v34, 0.0 }
  0xd1   :  { %205 = vmatpush.msra.mxu1 %v159_v38 }
  0xd3   :  { %206 = vmatpush.msra.mxu1 %v158_v39 }
  0xd5   :  { %207 = vmatpush.msra.mxu1 %v157_v41 }
  0xd7   :  { %208 = vmatpush.msra.mxu1 %v156_v42 }
  0xd8   :  { %295 = vmatmul.msk.f32.vlgmr.msra.gmra.mxu1 %vm180_vm1, %v160_v43 }
  0xe0   :  { %296 = vmatmul.msk.f32.gmra.mxu1 %vm180_vm1, %v161_v44 }
  0xe8   :  { %297 = vmatmul.msk.f32.gmra.mxu1 %vm180_vm1, %v162_v45 }
  0xf0   :  { %298 = vmatmul.msk.f32.gmra.mxu1 %vm180_vm1, %v163_v46 }
 0x155   :  { %v210_v48 = vpop.f32.mrf.mxu1 }
 0x156   :  { %v211_v56 = vadd.f32 %v210_v48, %v166_v47 }
 0x158   :  { %v222_v60 = vmax.f32 %v211_v56, 0.0 }
 0x15a   :  { %v242_v1 = vmul.f32 %v228_v54, %v222_v60 }
 0x15d   :  { %v213_v50 = vpop.f32.mrf.mxu1 }
 0x15e   :  { %v214_v53 = vadd.f32 %v213_v50, %v170_v49 }
 0x160   :  { %v223_v58 = vmax.f32 %v214_v53, 0.0 }
 0x162   :  { %v243_v62 = vmul.f32 %v232_v59, %v223_v58 }
 0x164   :  { %v246_v5 = vadd.f32 %v243_v62, %v242_v1 }
 0x165   :  { %v216_v55 = vpop.f32.mrf.mxu1 }
 0x166   :  { %v217_v57 = vadd.f32 %v216_v55, %v174_v52 }
 0x168   :  { %v224_v61 = vmax.f32 %v217_v57, 0.0 }
 0x16a   :  { %v244_v2 = vmul.f32 %v236_v63, %v224_v61 }
 0x16c   :  { %v247_v7 = vadd.f32 %v246_v5, %v244_v2 }
 0x16d   :  { %v219_v0 = vpop.f32.mrf.mxu1 }
 0x16e   :  { %v220_v3 = vadd.f32 %v219_v0, %v178_v51 }
 0x170   :  { %v225_v6 = vmax.f32 %v220_v3, 0.0 }
 0x172   :  { %v245_v8 = vmul.f32 %v240_v4, %v225_v6 }
 0x174   :  { %v248_v9 = vadd.f32 %v247_v7, %v245_v8 }
 0x176   :  { %v249_v10 = vrot.slane %v248_v9, 4 }
 0x178   :  { %v250_v11 = vadd.f32 %v249_v10, %v248_v9 }
 0x17a   :  { %v251_v12 = vrot.slane %v250_v11, 2 }
 0x17c   :  { %v252_v13 = vadd.f32 %v251_v12, %v250_v11 }
 0x17e   :  { %v253_v14 = vrot.slane %v252_v13, 1 }
 0x180   :  { %v254_v16 = vadd.f32 %v253_v14, %v252_v13 }
 0x182   :  { %v257_v17 = vadd.f32 %v256_v15, %v254_v16 }
 0x184   :  { %258 = vst [vmem:[#allocation3] sm:$0x1] %v257_v17 }
 0x185   :  { %269 = dma.vmem_to_hbm [thread:$0]  %s265_s23, 16, %s267_s26, [#allocation4]  }
 0x186   :  { %367 = dma.done.wait [#allocation4], 16  }
 0x187   :  { %368 = vsyncadd [#allocation4], 4294967280 }
 0x188   :  { %274 = vsyncpa [#allocation4], 1 }

</bundles_post_ra>
